<compile_context>
chip_gen: v5e
topology: v5e:2x2
jax: 0.10.0
libtpu: 0.0.40
codegen_flags: <defaults>
</compile_context>

<pallas_src>
import math

import jax
import jax.numpy as jnp
from jax import lax
from jax.experimental import pallas as pl
from jax.experimental.pallas import tpu as pltpu


def _round_up(a: int, m: int) -> int:
    return (a + m - 1) // m * m


def _cdiv(a: int, b: int) -> int:
    return (a + b - 1) // b


def _vae_forward_kernel(x_ref, eps_ref,
                        we1_ref, be1_ref, we2_ref, be2_ref,
                        wd1_ref, bd1_ref, wd2_ref, bd2_ref,
                        musigma_ref, xmean_ref):
    """Encoder MLP -> reparameterized sample -> decoder MLP for one batch tile."""
    x = x_ref[...]                                   # (TB, D)  f32 or bf16
    eps_w = eps_ref[...].astype(jnp.float32)         # (TB, 2L) [1 | eps]

    # --- encoder (bf16 MXU inputs, f32 accumulation) ---
    h = jnp.tanh(
        jnp.dot(x.astype(jnp.bfloat16), we1_ref[...],
                preferred_element_type=jnp.float32) + be1_ref[...])          # (TB, H)
    enc = jnp.dot(h.astype(jnp.bfloat16), we2_ref[...],
                  preferred_element_type=jnp.float32) + be2_ref[...]         # (TB, 2L) = [mu | log_var]

    two_l = musigma_ref.shape[1]
    latent = two_l // 2
    lane = lax.broadcasted_iota(jnp.int32, enc.shape, dimension=1)
    is_mu = lane < latent                            # first half lanes mu, second half log_var

    # sigma = exp(0.5*log_var) on the sigma half; exp(0)=1 on the mu half.
    sigma_full = jnp.exp(0.5 * jnp.where(is_mu, 0.0, enc))                   # [1 | sigma]
    musigma = jnp.where(is_mu, enc, sigma_full)                              # [mu | sigma]
    musigma_ref[...] = musigma                       # single lane-dense 128-wide store

    # --- reparameterization + decoder ---
    # a = [mu | sigma*eps]; wd1 rows are duplicated so a @ [wd1;wd1] == (mu + sigma*eps) @ wd1.
    # (mu and sigma*eps are rounded to bf16 separately; within stated tolerances.)
    a = musigma * eps_w                                                      # (TB, 2L)
    hd = jnp.tanh(
        jnp.dot(a.astype(jnp.bfloat16), wd1_ref[...],
                preferred_element_type=jnp.float32) + bd1_ref[...])          # (TB, H)
    xmean_ref[...] = jnp.dot(hd.astype(jnp.bfloat16), wd2_ref[...],
                             preferred_element_type=jnp.float32) + bd2_ref[...]


def prepare_params(params):
    """One-time conversion of f32 params to the kernel layout.

    Hoisted out of the forward so the bf16 casts and the wd1 row-duplication are not
    re-executed (and their HBM traffic not re-paid) on every call.
    """
    f32, bf16 = jnp.float32, jnp.bfloat16
    return dict(
        we1=params["we1"].astype(bf16),
        be1=params["be1"].astype(f32).reshape(1, -1),
        we2=params["we2"].astype(bf16),
        be2=params["be2"].astype(f32).reshape(1, -1),
        # duplicate decoder-1 rows so the decoder contraction K = 2*latent (no z slicing)
        wd1_dup=jnp.concatenate([params["wd1"], params["wd1"]], axis=0).astype(bf16),
        bd1=params["bd1"].astype(f32).reshape(1, -1),
        wd2=params["wd2"].astype(bf16),
        bd2=params["bd2"].astype(f32).reshape(1, -1),
    )


def gaussian_vae_forward(x_nchw, eps, prepped):
    """GaussianVAE forward in one Pallas kernel.

    Args:
      x_nchw:  (B, C, H, W) input (PyTorch NCHW convention), f32 or bf16.
      eps:     (B, latent_dim) standard-normal noise for rsample.
      prepped: output of prepare_params().

    Returns:
      (mu, sigma, x_mean): posterior Normal params and reconstruction mean (scale fixed to 1).
    """
    b = x_nchw.shape[0]
    d = int(math.prod(x_nchw.shape[1:]))
    latent = eps.shape[1]
    two_l = 2 * latent

    x_flat = x_nchw.reshape(b, d)
    if x_flat.dtype not in (jnp.float32, jnp.bfloat16):
        x_flat = x_flat.astype(jnp.float32)

    # eps laid out lane-aligned with the sigma half: [1 | eps], shipped in bf16
    # (decoder input is truncated to bf16 for the MXU anyway).
    eps_wide = jnp.concatenate(
        [jnp.ones_like(eps), eps], axis=1).astype(jnp.bfloat16)              # (B, 2L)

    # --- batch tiling ---
    # Multiple-of-8 tile, capped at 512 rows (v5e 16 MiB scoped-VMEM safe), sized so there
    # are >= 2 grid tiles whenever B >= 9 (v7x megacore).  Non-divisible batches use a
    # partial last tile (no wrapper-side jnp.pad of x); only tiny batches (< 8) are padded.
    tb = min(512, _round_up(max(_cdiv(b, 2), 1), 8))
    b_pad = b
    if b < tb:
        b_pad = tb
        x_flat = jnp.pad(x_flat, ((0, b_pad - b), (0, 0)))
        eps_wide = jnp.pad(eps_wide, ((0, b_pad - b), (0, 0)))
    grid = (_cdiv(b_pad, tb),)

    we1, be1 = prepped["we1"], prepped["be1"]
    we2, be2 = prepped["we2"], prepped["be2"]
    wd1_dup, bd1 = prepped["wd1_dup"], prepped["bd1"]
    wd2, bd2 = prepped["wd2"], prepped["bd2"]
    hidden = we1.shape[1]

    def batch_spec(cols):
        return pl.BlockSpec((tb, cols), lambda i: (i, 0))

    def resident(arr):  # weights/biases: same block every grid step -> stay VMEM-resident
        return pl.BlockSpec(arr.shape, lambda i: (0, 0))

    rows = grid[0] * tb
    x_bytes = 2 if x_flat.dtype == jnp.bfloat16 else 4
    flops = 2 * rows * (d * hidden + hidden * two_l + two_l * hidden + hidden * d)
    transcendentals = rows * (2 * hidden + two_l)
    bytes_accessed = (
        rows * d * x_bytes + rows * two_l * 2
        + (we1.size + we2.size + wd1_dup.size + wd2.size) * 2
        + (be1.size + be2.size + bd1.size + bd2.size) * 4
        + rows * two_l * 4 + rows * d * 4
    )

    musigma, x_mean = pl.pallas_call(
        _vae_forward_kernel,
        out_shape=(
            jax.ShapeDtypeStruct((b_pad, two_l), jnp.float32),   # [mu | sigma] slab
            jax.ShapeDtypeStruct((b_pad, d), jnp.float32),       # reconstruction mean
        ),
        grid_spec=pltpu.PrefetchScalarGridSpec(
            num_scalar_prefetch=0,
            grid=grid,
            in_specs=[
                batch_spec(d),        # x
                batch_spec(two_l),    # eps slab [1 | eps]
                resident(we1), resident(be1), resident(we2), resident(be2),
                resident(wd1_dup), resident(bd1), resident(wd2), resident(bd2),
            ],
            out_specs=[
                batch_spec(two_l),
                batch_spec(d),
            ],
        ),
        compiler_params=pltpu.CompilerParams(
            dimension_semantics=("parallel",),   # v7x: split batch tiles across both TCs
        ),
        cost_estimate=pl.CostEstimate(
            flops=flops, transcendentals=transcendentals, bytes_accessed=bytes_accessed),
    )(x_flat, eps_wide, we1, be1, we2, be2, wd1_dup, bd1, wd2, bd2)

    if b_pad != b:
        musigma = musigma[:b]
        x_mean = x_mean[:b]
    mu = musigma[:, :latent]
    sigma = musigma[:, latent:]
    return mu, sigma, x_mean


def init_params(key, d_in, hidden, latent):
    """Deterministic param init (PyTorch-Linear-style uniform +/- 1/sqrt(fan_in))."""
    ks = jax.random.split(key, 4)

    def lin(k, fan_in, fan_out):
        bound = 1.0 / jnp.sqrt(fan_in)
        kw, kb = jax.random.split(k)
        w = jax.random.uniform(kw, (fan_in, fan_out), jnp.float32, -bound, bound)
        b = jax.random.uniform(kb, (1, fan_out), jnp.float32, -bound, bound)
        return w, b

    we1, be1 = lin(ks[0], d_in, hidden)
    we2, be2 = lin(ks[1], hidden, 2 * latent)
    wd1, bd1 = lin(ks[2], latent, hidden)
    wd2, bd2 = lin(ks[3], hidden, d_in)
    return dict(we1=we1, be1=be1, we2=we2, be2=be2,
                wd1=wd1, bd1=bd1, wd2=wd2, bd2=bd2)


def _reference_forward(x_nchw, eps, p):
    """Plain-JAX f32 reference implementing the module semantics exactly."""
    b = x_nchw.shape[0]
    x = x_nchw.reshape(b, -1).astype(jnp.float32)
    h = jnp.tanh(x @ p["we1"] + p["be1"])
    enc = h @ p["we2"] + p["be2"]
    latent = eps.shape[1]
    mu, log_var = enc[:, :latent], enc[:, latent:]
    sigma = jnp.exp(0.5 * log_var)
    z = mu + sigma * eps
    hd = jnp.tanh(z @ p["wd1"] + p["bd1"])
    x_mean = hd @ p["wd2"] + p["bd2"]
    return mu, sigma, x_mean


if __name__ == "__main__":
    # Small shapes consistent with a conv-style VAE input.
    B, C, H, W = 2, 4, 16, 16          # NCHW
    D_IN = C * H * W                   # 1024 flattened features
    HIDDEN = 128
    LATENT = 64

    key = jax.random.PRNGKey(0)
    kx, keps, kp, kx2, keps2 = jax.random.split(key, 5)

    params = init_params(kp, D_IN, HIDDEN, LATENT)
    prepped = prepare_params(params)   # one-time weight prep, out of the hot path
    fwd = jax.jit(gaussian_vae_forward)

    # --- case 1: tiny batch (single tile, padded to 8 rows) ---
    x = jax.random.normal(kx, (B, C, H, W), dtype=jnp.float32)
    eps = jax.random.normal(keps, (B, LATENT), dtype=jnp.float32)  # noise for rsample
    mu, sigma, x_mean = fwd(x, eps, prepped)
    jax.block_until_ready((mu, sigma, x_mean))

    mu_r, sigma_r, x_mean_r = _reference_forward(x, eps, params)
    assert mu.shape == (B, LATENT) and sigma.shape == (B, LATENT) and x_mean.shape == (B, D_IN)
    assert jnp.allclose(mu, mu_r, atol=1e-2, rtol=1e-2)
    assert jnp.allclose(sigma, sigma_r, atol=1e-2, rtol=1e-2)
    assert jnp.allclose(x_mean, x_mean_r, atol=3e-2, rtol=3e-2)

    # --- case 2: multi-tile grid, batch not a multiple of 8 (partial last tile, no x pad) ---
    B2 = 20
    x2 = jax.random.normal(kx2, (B2, C, H, W), dtype=jnp.float32)
    eps2 = jax.random.normal(keps2, (B2, LATENT), dtype=jnp.float32)
    mu2, sigma2, x_mean2 = fwd(x2, eps2, prepped)
    jax.block_until_ready((mu2, sigma2, x_mean2))

    mu2_r, sigma2_r, x_mean2_r = _reference_forward(x2, eps2, params)
    assert mu2.shape == (B2, LATENT) and sigma2.shape == (B2, LATENT) and x_mean2.shape == (B2, D_IN)
    assert jnp.allclose(mu2, mu2_r, atol=1e-2, rtol=1e-2)
    assert jnp.allclose(sigma2, sigma2_r, atol=1e-2, rtol=1e-2)
    assert jnp.allclose(x_mean2, x_mean2_r, atol=3e-2, rtol=3e-2)

    print("KERNEL_OK")
</pallas_src>

<mosaic_0001>
module attributes {stable_mosaic.version = 11 : i64} {
  func.func @_vae_forward_kernel(%arg0: i32, %arg1: memref<8x1024xf32, #tpu.memory_space<vmem>>, %arg2: memref<8x128xbf16, #tpu.memory_space<vmem>>, %arg3: memref<1024x128xbf16, #tpu.memory_space<vmem>>, %arg4: memref<1x128xf32, #tpu.memory_space<vmem>>, %arg5: memref<128x128xbf16, #tpu.memory_space<vmem>>, %arg6: memref<1x128xf32, #tpu.memory_space<vmem>>, %arg7: memref<128x128xbf16, #tpu.memory_space<vmem>>, %arg8: memref<1x128xf32, #tpu.memory_space<vmem>>, %arg9: memref<128x1024xbf16, #tpu.memory_space<vmem>>, %arg10: memref<1x1024xf32, #tpu.memory_space<vmem>>, %arg11: memref<8x128xf32, #tpu.memory_space<vmem>>, %arg12: memref<8x1024xf32, #tpu.memory_space<vmem>>) attributes {dimension_semantics = [#tpu.dimension_semantics<parallel>], iteration_bounds = array<i64: 1>, scalar_prefetch = 0 : i64, scratch_operands = 0 : i64, tpu.core_type = #tpu.core_type<tc>, window_params = [{transform_indices = @transform_0, window_bounds = array<i64: 8, 1024>}, {transform_indices = @transform_1, window_bounds = array<i64: 8, 128>}, {pipeline_mode = #tpu.pipeline_mode<synchronous>, transform_indices = @transform_2, window_bounds = array<i64: 1024, 128>}, {pipeline_mode = #tpu.pipeline_mode<synchronous>, transform_indices = @transform_3, window_bounds = array<i64: 1, 128>}, {pipeline_mode = #tpu.pipeline_mode<synchronous>, transform_indices = @transform_4, window_bounds = array<i64: 128, 128>}, {pipeline_mode = #tpu.pipeline_mode<synchronous>, transform_indices = @transform_5, window_bounds = array<i64: 1, 128>}, {pipeline_mode = #tpu.pipeline_mode<synchronous>, transform_indices = @transform_6, window_bounds = array<i64: 128, 128>}, {pipeline_mode = #tpu.pipeline_mode<synchronous>, transform_indices = @transform_7, window_bounds = array<i64: 1, 128>}, {pipeline_mode = #tpu.pipeline_mode<synchronous>, transform_indices = @transform_8, window_bounds = array<i64: 128, 1024>}, {pipeline_mode = #tpu.pipeline_mode<synchronous>, transform_indices = @transform_9, window_bounds = array<i64: 1, 1024>}, {transform_indices = @transform_10, window_bounds = array<i64: 8, 128>}, {transform_indices = @transform_11, window_bounds = array<i64: 8, 1024>}]} {
    %c0 = arith.constant 0 : index
    %c0_0 = arith.constant 0 : index
    %0 = vector.load %arg1[%c0, %c0_0] : memref<8x1024xf32, #tpu.memory_space<vmem>>, vector<8x1024xf32>
    %c0_1 = arith.constant 0 : index
    %c0_2 = arith.constant 0 : index
    %1 = vector.load %arg2[%c0_1, %c0_2] : memref<8x128xbf16, #tpu.memory_space<vmem>>, vector<8x128xbf16>
    %2 = arith.extf %1 : vector<8x128xbf16> to vector<8x128xf32>
    %3 = arith.truncf %0 : vector<8x1024xf32> to vector<8x1024xbf16>
    %c0_3 = arith.constant 0 : index
    %c0_4 = arith.constant 0 : index
    %4 = vector.load %arg3[%c0_3, %c0_4] : memref<1024x128xbf16, #tpu.memory_space<vmem>>, vector<1024x128xbf16>
    %cst = arith.constant dense<0.000000e+00> : vector<8x128xf32>
    %5 = tpu.matmul %3, %4, %cst {dimension_numbers = #tpu.dot_dimension_numbers<[1], [0], [0], [1], [0, 0, 1, 1], [], []>} : vector<8x1024xbf16>, vector<1024x128xbf16>, vector<8x128xf32> -> vector<8x128xf32>
    %c0_5 = arith.constant 0 : index
    %c0_6 = arith.constant 0 : index
    %6 = vector.load %arg4[%c0_5, %c0_6] : memref<1x128xf32, #tpu.memory_space<vmem>>, vector<1x128xf32>
    %7 = vector.broadcast %6 : vector<1x128xf32> to vector<8x128xf32>
    %8 = arith.addf %5, %7 : vector<8x128xf32>
    %9 = math.tanh %8 : vector<8x128xf32>
    %10 = arith.truncf %9 : vector<8x128xf32> to vector<8x128xbf16>
    %c0_7 = arith.constant 0 : index
    %c0_8 = arith.constant 0 : index
    %11 = vector.load %arg5[%c0_7, %c0_8] : memref<128x128xbf16, #tpu.memory_space<vmem>>, vector<128x128xbf16>
    %cst_9 = arith.constant dense<0.000000e+00> : vector<8x128xf32>
    %12 = tpu.matmul %10, %11, %cst_9 {dimension_numbers = #tpu.dot_dimension_numbers<[1], [0], [0], [1], [0, 0, 1, 1], [], []>} : vector<8x128xbf16>, vector<128x128xbf16>, vector<8x128xf32> -> vector<8x128xf32>
    %c0_10 = arith.constant 0 : index
    %c0_11 = arith.constant 0 : index
    %13 = vector.load %arg6[%c0_10, %c0_11] : memref<1x128xf32, #tpu.memory_space<vmem>>, vector<1x128xf32>
    %14 = vector.broadcast %13 : vector<1x128xf32> to vector<8x128xf32>
    %15 = arith.addf %12, %14 : vector<8x128xf32>
    %16 = tpu.iota {dimensions = array<i32: 1>} : vector<8x128xi32>
    %c64_i32 = arith.constant 64 : i32
    %17 = vector.broadcast %c64_i32 : i32 to vector<8x128xi32>
    %18 = arith.cmpi slt, %16, %17 : vector<8x128xi32>
    %cst_12 = arith.constant 0.000000e+00 : f32
    %19 = vector.broadcast %cst_12 : f32 to vector<8x128xf32>
    %20 = arith.select %18, %19, %15 : vector<8x128xi1>, vector<8x128xf32>
    %cst_13 = arith.constant 5.000000e-01 : f32
    %21 = vector.broadcast %cst_13 : f32 to vector<8x128xf32>
    %22 = arith.mulf %21, %20 : vector<8x128xf32>
    %23 = math.exp %22 : vector<8x128xf32>
    %24 = arith.select %18, %15, %23 : vector<8x128xi1>, vector<8x128xf32>
    %c0_14 = arith.constant 0 : index
    %c0_15 = arith.constant 0 : index
    %25 = vector.load %arg11[%c0_14, %c0_15] : memref<8x128xf32, #tpu.memory_space<vmem>>, vector<8x128xf32>
    tpu.vector_store %arg11[%c0_14, %c0_15], %24 {strides = array<i32>} : memref<8x128xf32, #tpu.memory_space<vmem>>, vector<8x128xf32>,
    %26 = arith.mulf %24, %2 : vector<8x128xf32>
    %27 = arith.truncf %26 : vector<8x128xf32> to vector<8x128xbf16>
    %c0_16 = arith.constant 0 : index
    %c0_17 = arith.constant 0 : index
    %28 = vector.load %arg7[%c0_16, %c0_17] : memref<128x128xbf16, #tpu.memory_space<vmem>>, vector<128x128xbf16>
    %cst_18 = arith.constant dense<0.000000e+00> : vector<8x128xf32>
    %29 = tpu.matmul %27, %28, %cst_18 {dimension_numbers = #tpu.dot_dimension_numbers<[1], [0], [0], [1], [0, 0, 1, 1], [], []>} : vector<8x128xbf16>, vector<128x128xbf16>, vector<8x128xf32> -> vector<8x128xf32>
    %c0_19 = arith.constant 0 : index
    %c0_20 = arith.constant 0 : index
    %30 = vector.load %arg8[%c0_19, %c0_20] : memref<1x128xf32, #tpu.memory_space<vmem>>, vector<1x128xf32>
    %31 = vector.broadcast %30 : vector<1x128xf32> to vector<8x128xf32>
    %32 = arith.addf %29, %31 : vector<8x128xf32>
    %33 = math.tanh %32 : vector<8x128xf32>
    %34 = arith.truncf %33 : vector<8x128xf32> to vector<8x128xbf16>
    %c0_21 = arith.constant 0 : index
    %c0_22 = arith.constant 0 : index
    %35 = vector.load %arg9[%c0_21, %c0_22] : memref<128x1024xbf16, #tpu.memory_space<vmem>>, vector<128x1024xbf16>
    %cst_23 = arith.constant dense<0.000000e+00> : vector<8x1024xf32>
    %36 = tpu.matmul %34, %35, %cst_23 {dimension_numbers = #tpu.dot_dimension_numbers<[1], [0], [0], [1], [0, 0, 1, 1], [], []>} : vector<8x128xbf16>, vector<128x1024xbf16>, vector<8x1024xf32> -> vector<8x1024xf32>
    %c0_24 = arith.constant 0 : index
    %c0_25 = arith.constant 0 : index
    %37 = vector.load %arg10[%c0_24, %c0_25] : memref<1x1024xf32, #tpu.memory_space<vmem>>, vector<1x1024xf32>
    %38 = vector.broadcast %37 : vector<1x1024xf32> to vector<8x1024xf32>
    %39 = arith.addf %36, %38 : vector<8x1024xf32>
    %c0_26 = arith.constant 0 : index
    %c0_27 = arith.constant 0 : index
    %40 = vector.load %arg12[%c0_26, %c0_27] : memref<8x1024xf32, #tpu.memory_space<vmem>>, vector<8x1024xf32>
    tpu.vector_store %arg12[%c0_26, %c0_27], %39 {strides = array<i32>} : memref<8x1024xf32, #tpu.memory_space<vmem>>, vector<8x1024xf32>,
    return
  }
  func.func @transform_0(%arg0: i32) -> (i32, i32) {
    %c0_i32 = arith.constant 0 : i32
    %c0_i32_0 = arith.constant 0 : i32
    return %arg0, %c0_i32 : i32, i32
  }
  func.func @transform_1(%arg0: i32) -> (i32, i32) {
    %c0_i32 = arith.constant 0 : i32
    %c0_i32_0 = arith.constant 0 : i32
    return %arg0, %c0_i32 : i32, i32
  }
  func.func @transform_2(%arg0: i32) -> (i32, i32) {
    %c0_i32 = arith.constant 0 : i32
    %c0_i32_0 = arith.constant 0 : i32
    %c0_i32_1 = arith.constant 0 : i32
    return %c0_i32, %c0_i32_0 : i32, i32
  }
  func.func @transform_3(%arg0: i32) -> (i32, i32) {
    %c0_i32 = arith.constant 0 : i32
    %c0_i32_0 = arith.constant 0 : i32
    %c0_i32_1 = arith.constant 0 : i32
    return %c0_i32, %c0_i32_0 : i32, i32
  }
  func.func @transform_4(%arg0: i32) -> (i32, i32) {
    %c0_i32 = arith.constant 0 : i32
    %c0_i32_0 = arith.constant 0 : i32
    %c0_i32_1 = arith.constant 0 : i32
    return %c0_i32, %c0_i32_0 : i32, i32
  }
  func.func @transform_5(%arg0: i32) -> (i32, i32) {
    %c0_i32 = arith.constant 0 : i32
    %c0_i32_0 = arith.constant 0 : i32
    %c0_i32_1 = arith.constant 0 : i32
    return %c0_i32, %c0_i32_0 : i32, i32
  }
  func.func @transform_6(%arg0: i32) -> (i32, i32) {
    %c0_i32 = arith.constant 0 : i32
    %c0_i32_0 = arith.constant 0 : i32
    %c0_i32_1 = arith.constant 0 : i32
    return %c0_i32, %c0_i32_0 : i32, i32
  }
  func.func @transform_7(%arg0: i32) -> (i32, i32) {
    %c0_i32 = arith.constant 0 : i32
    %c0_i32_0 = arith.constant 0 : i32
    %c0_i32_1 = arith.constant 0 : i32
    return %c0_i32, %c0_i32_0 : i32, i32
  }
  func.func @transform_8(%arg0: i32) -> (i32, i32) {
    %c0_i32 = arith.constant 0 : i32
    %c0_i32_0 = arith.constant 0 : i32
    %c0_i32_1 = arith.constant 0 : i32
    return %c0_i32, %c0_i32_0 : i32, i32
  }
  func.func @transform_9(%arg0: i32) -> (i32, i32) {
    %c0_i32 = arith.constant 0 : i32
    %c0_i32_0 = arith.constant 0 : i32
    %c0_i32_1 = arith.constant 0 : i32
    return %c0_i32, %c0_i32_0 : i32, i32
  }
  func.func @transform_10(%arg0: i32) -> (i32, i32) {
    %c0_i32 = arith.constant 0 : i32
    %c0_i32_0 = arith.constant 0 : i32
    return %arg0, %c0_i32 : i32, i32
  }
  func.func @transform_11(%arg0: i32) -> (i32, i32) {
    %c0_i32 = arith.constant 0 : i32
    %c0_i32_0 = arith.constant 0 : i32
    return %arg0, %c0_i32 : i32, i32
  }
}

</mosaic_0001>

<bundles_post_ra>
// kernel: gaussian_vae_forward.1
= control target key start
LH: loop header
LB: loop body
LE: loop exit
PB: predicated region body
PF: predicated region fallthrough
CT: control target
= control target key end

     0   :  { %17 = vsyncpa [#allocation3], 0  ;;  %s2392_s0 = inlined_call_operand.vmem [shape: f32[8,1024], index: 0, kind: input, shape index: {}]   ;;  %s2393_s1 = inlined_call_operand.vmem [shape: bf16[8,128], index: 1, kind: input, shape index: {}]   ;;  %s2394_s2 = inlined_call_operand.hbm [shape: bf16[1024,128], index: 2, kind: input, shape index: {}]   ;;  %s2395_s3 = inlined_call_operand.vmem [shape: f32[1,128], index: 3, kind: input, shape index: {}]   ;;  %s2396_s4 = inlined_call_operand.vmem [shape: bf16[128,128], index: 4, kind: input, shape index: {}]   ;;  %s2397_s5 = inlined_call_operand.vmem [shape: f32[1,128], index: 5, kind: input, shape index: {}]   ;;  %s2398_s6 = inlined_call_operand.vmem [shape: bf16[128,128], index: 6, kind: input, shape index: {}]   ;;  %s2399_s7 = inlined_call_operand.vmem [shape: f32[1,128], index: 7, kind: input, shape index: {}]   ;;  %s2400_s8 = inlined_call_operand.hbm [shape: bf16[128,1024], index: 8, kind: input, shape index: {}]   ;;  %s2401_s9 = inlined_call_operand.vmem [shape: f32[1,1024], index: 9, kind: input, shape index: {}]   ;;  %s2402_s10 = inlined_call_operand.vmem [shape: f32[8,128], index: 10, kind: output, shape index: {0}]   ;;  %s2403_s11 = inlined_call_operand.vmem [shape: f32[8,1024], index: 11, kind: output, shape index: {1}]  }
   0x1   :  { %s27_s19 = sshll.u32 %s2394_s2, 4  ;;  %s28_s19 = int_to_ptr.hbm [resolvable:$true] %s27_s19 }
   0x2   :  { %18 = vsyncpa [#allocation5], 0  ;;  %s2195_s20 = smov [#allocation2]   ;;  %s50_s24 = sshll.u32 %s2400_s8, 4  ;;  %s51_s24 = int_to_ptr.hbm [resolvable:$true] %s50_s24 }
   0x3   :  { %s29_s21 = sshll.u32 %s2195_s20, 4  ;;  %s2196_s25 = smov 64   ;;  %s30_s21 = int_to_ptr.vmem [resolvable:$true] %s29_s21 }
   0x4   :  { %s2197_s26 = smov 4   ;;  %s2198_s27 = smov [#allocation4]  }
   0x5   :  { %35 = dma.hbm_to_vmem [thread:$0]  %s28_s19, 8192, %s30_s21, [#allocation3], %s2196_s25, %s2196_s25, %s2197_s26  }
   0x6   :  { %s52_s28 = sshll.u32 %s2198_s27, 4  ;;  %s2199_s29 = smov 512   ;;  %s53_s28 = int_to_ptr.vmem [resolvable:$true] %s52_s28 }
   0x7   :  { %s2200_s30 = smov 32  }
   0x8   :  { %58 = dma.hbm_to_vmem [thread:$0]  %s51_s24, 8192, %s53_s28, [#allocation5], %s2199_s29, %s2199_s29, %s2200_s30  }
   0x9   :  { %2191 = dma.done.wait [#allocation3], 8192  }
   0xa   :  { %2192 = vsyncadd [#allocation3], 4294959104 }
   0xb   :  { %2193 = dma.done.wait [#allocation5], 8192  }
   0xc   :  { %2194 = vsyncadd [#allocation5], 4294959104  ;;  %v1991_v0 = vld [vmem:[#allocation2 + $0x38] sm:$0xff]  ;;  %v1990_v4 = vld [vmem:[#allocation2 + $0x30] sm:$0xff] }
   0xd   :  { %v1999_v1 = vld [vmem:[#allocation2 + $0x78] sm:$0xff]  ;;  %603 = vmatpush.bf16.msra.mxu0 %v1991_v0  ;;  %v1998_v5 = vld [vmem:[#allocation2 + $0x70] sm:$0xff]  ;;  %v1989_v8 = vld [vmem:[#allocation2 + $0x28] sm:$0xff] }
   0xe   :  { %v2007_v2 = vld [vmem:[#allocation2 + $0xb8] sm:$0xff]  ;;  %616 = vmatpush.bf16.msra.mxu1 %v1999_v1  ;;  %v2006_v6 = vld [vmem:[#allocation2 + $0xb0] sm:$0xff]  ;;  %v1997_v9 = vld [vmem:[#allocation2 + $0x68] sm:$0xff] }
   0xf   :  { %v2015_v3 = vld [vmem:[#allocation2 + $0xf8] sm:$0xff]  ;;  %629 = vmatpush.bf16.msra.mxu2 %v2007_v2  ;;  %v2014_v7 = vld [vmem:[#allocation2 + $0xf0] sm:$0xff]  ;;  %v2005_v10 = vld [vmem:[#allocation2 + $0xa8] sm:$0xff] }
  0x10   :  { %642 = vmatpush.bf16.msra.mxu3 %v2015_v3  ;;  %v2013_v11 = vld [vmem:[#allocation2 + $0xe8] sm:$0xff]  ;;  %v1988_v12 = vld [vmem:[#allocation2 + $0x20] sm:$0xff]  ;;  %v1987_v16 = vld [vmem:[#allocation2 + $0x18] sm:$0xff] }
  0x11   :  { %604 = vmatpush.bf16.msra.mxu0 %v1990_v4  ;;  %v1996_v13 = vld [vmem:[#allocation2 + $0x60] sm:$0xff]  ;;  %v1995_v17 = vld [vmem:[#allocation2 + $0x58] sm:$0xff]  ;;  %v1986_v20 = vld [vmem:[#allocation2 + $0x10] sm:$0xff] }
  0x12   :  { %617 = vmatpush.bf16.msra.mxu1 %v1998_v5  ;;  %v2004_v14 = vld [vmem:[#allocation2 + $0xa0] sm:$0xff]  ;;  %v2003_v18 = vld [vmem:[#allocation2 + $0x98] sm:$0xff]  ;;  %v1994_v21 = vld [vmem:[#allocation2 + $0x50] sm:$0xff] }
  0x13   :  { %630 = vmatpush.bf16.msra.mxu2 %v2006_v6  ;;  %v2012_v15 = vld [vmem:[#allocation2 + $0xe0] sm:$0xff]  ;;  %v2011_v19 = vld [vmem:[#allocation2 + $0xd8] sm:$0xff]  ;;  %v2002_v22 = vld [vmem:[#allocation2 + $0x90] sm:$0xff] }
  0x14   :  { %643 = vmatpush.bf16.msra.mxu3 %v2014_v7  ;;  %v2010_v23 = vld [vmem:[#allocation2 + $0xd0] sm:$0xff]  ;;  %v1985_v24 = vld [vmem:[#allocation2 + $0x8] sm:$0xff]  ;;  %v1984_v28 = vld [vmem:[#allocation2] sm:$0xff] }
  0x15   :  { %605 = vmatpush.bf16.msra.mxu0 %v1989_v8  ;;  %v1993_v25 = vld [vmem:[#allocation2 + $0x48] sm:$0xff]  ;;  %v1992_v29 = vld [vmem:[#allocation2 + $0x40] sm:$0xff]  ;;  %v2023_v32 = vld [vmem:[#allocation2 + $0x138] sm:$0xff] }
  0x16   :  { %618 = vmatpush.bf16.msra.mxu1 %v1997_v9  ;;  %v2001_v26 = vld [vmem:[#allocation2 + $0x88] sm:$0xff]  ;;  %v2000_v30 = vld [vmem:[#allocation2 + $0x80] sm:$0xff]  ;;  %v71_v33 = vld [vmem:[%s2392_s0 + $0x10] sm:$0xff] }
  0x17   :  { %631 = vmatpush.bf16.msra.mxu2 %v2005_v10  ;;  %v2009_v27 = vld [vmem:[#allocation2 + $0xc8] sm:$0xff]  ;;  %v2008_v31 = vld [vmem:[#allocation2 + $0xc0] sm:$0xff]  ;;  %v2031_v35 = vld [vmem:[#allocation2 + $0x178] sm:$0xff]  ;;  %v81_v40 = vpack.c.bf16 %v71_v33, %v71_v33 }
  0x18   :  { %644 = vmatpush.bf16.msra.mxu3 %v2013_v11  ;;  %v69_v34 = vld [vmem:[%s2392_s0] sm:$0xff]  ;;  %v72_v36 = vld [vmem:[%s2392_s0 + $0x18] sm:$0xff]  ;;  %v70_v37 = vld [vmem:[%s2392_s0 + $0x8] sm:$0xff] }
  0x19   :  { %606 = vmatpush.bf16.msra.mxu0 %v1988_v12  ;;  %v2039_v38 = vld [vmem:[#allocation2 + $0x1b8] sm:$0xff]  ;;  %v79_v41 = vpack.c.bf16 %v69_v34, %v69_v34  ;;  %v82_v42 = vpack.c.bf16 %v72_v36, %v72_v36  ;;  %v80_v43 = vpack.c.bf16 %v70_v37, %v70_v37  ;;  %v2022_v44 = vld [vmem:[#allocation2 + $0x130] sm:$0xff]  ;;  %v2021_v48 = vld [vmem:[#allocation2 + $0x128] sm:$0xff] }
  0x1a   :  { %619 = vmatpush.bf16.msra.mxu1 %v1996_v13  ;;  %v2047_v39 = vld [vmem:[#allocation2 + $0x1f8] sm:$0xff]  ;;  %v2030_v45 = vld [vmem:[#allocation2 + $0x170] sm:$0xff]  ;;  %v2029_v49 = vld [vmem:[#allocation2 + $0x168] sm:$0xff] }
  0x1b   :  { %632 = vmatpush.bf16.msra.mxu2 %v2004_v14  ;;  %v2038_v46 = vld [vmem:[#allocation2 + $0x1b0] sm:$0xff]  ;;  %v2037_v50 = vld [vmem:[#allocation2 + $0x1a8] sm:$0xff]  ;;  %v2020_v52 = vld [vmem:[#allocation2 + $0x120] sm:$0xff] }
  0x1c   :  { %645 = vmatpush.bf16.msra.mxu3 %v2012_v15  ;;  %v2046_v47 = vld [vmem:[#allocation2 + $0x1f0] sm:$0xff]  ;;  %v2045_v51 = vld [vmem:[#allocation2 + $0x1e8] sm:$0xff]  ;;  %v2028_v53 = vld [vmem:[#allocation2 + $0x160] sm:$0xff] }
  0x1d   :  { %607 = vmatpush.bf16.msra.mxu0 %v1987_v16  ;;  %v2036_v54 = vld [vmem:[#allocation2 + $0x1a0] sm:$0xff]  ;;  %v2019_v56 = vld [vmem:[#allocation2 + $0x118] sm:$0xff]  ;;  %v2018_v60 = vld [vmem:[#allocation2 + $0x110] sm:$0xff] }
  0x1e   :  { %620 = vmatpush.bf16.msra.mxu1 %v1995_v17  ;;  %v2044_v55 = vld [vmem:[#allocation2 + $0x1e0] sm:$0xff]  ;;  %v2027_v57 = vld [vmem:[#allocation2 + $0x158] sm:$0xff]  ;;  %v2026_v61 = vld [vmem:[#allocation2 + $0x150] sm:$0xff] }
  0x1f   :  { %633 = vmatpush.bf16.msra.mxu2 %v2003_v18  ;;  %v2035_v58 = vld [vmem:[#allocation2 + $0x198] sm:$0xff]  ;;  %v2034_v62 = vld [vmem:[#allocation2 + $0x190] sm:$0xff]  ;;  %v2017_v0 = vld [vmem:[#allocation2 + $0x108] sm:$0xff] }
  0x20   :  { %646 = vmatpush.bf16.msra.mxu3 %v2011_v19  ;;  %v2043_v59 = vld [vmem:[#allocation2 + $0x1d8] sm:$0xff]  ;;  %v2042_v63 = vld [vmem:[#allocation2 + $0x1d0] sm:$0xff]  ;;  %v2025_v1 = vld [vmem:[#allocation2 + $0x148] sm:$0xff] }
  0x21   :  { %608 = vmatpush.bf16.msra.mxu0 %v1986_v20  ;;  %v2033_v2 = vld [vmem:[#allocation2 + $0x188] sm:$0xff]  ;;  %v2016_v4 = vld [vmem:[#allocation2 + $0x100] sm:$0xff]  ;;  %v75_v10 = vld [vmem:[%s2392_s0 + $0x30] sm:$0xff] }
  0x22   :  { %621 = vmatpush.bf16.msra.mxu1 %v1994_v21  ;;  %v2041_v3 = vld [vmem:[#allocation2 + $0x1c8] sm:$0xff]  ;;  %v2024_v5 = vld [vmem:[#allocation2 + $0x140] sm:$0xff]  ;;  %v76_v11 = vld [vmem:[%s2392_s0 + $0x38] sm:$0xff]  ;;  %v85_v14 = vpack.c.bf16 %v75_v10, %v75_v10 }
  0x23   :  { %634 = vmatpush.bf16.msra.mxu2 %v2002_v22  ;;  %v2032_v6 = vld [vmem:[#allocation2 + $0x180] sm:$0xff]  ;;  %v74_v8 = vld [vmem:[%s2392_s0 + $0x28] sm:$0xff]  ;;  %v86_v15 = vpack.c.bf16 %v76_v11, %v76_v11  ;;  %v2055_v16 = vld [vmem:[%s2396_s4 + $0x38] sm:$0xff] }
  0x24   :  { %647 = vmatpush.bf16.msra.mxu3 %v2010_v23  ;;  %v73_v7 = vld [vmem:[%s2392_s0 + $0x20] sm:$0xff]  ;;  %v84_v13 = vpack.c.bf16 %v74_v8, %v74_v8  ;;  %v2054_v17 = vld [vmem:[%s2396_s4 + $0x30] sm:$0xff]  ;;  %v2053_v18 = vld [vmem:[%s2396_s4 + $0x28] sm:$0xff] }
  0x25   :  { %609 = vmatpush.bf16.msra.mxu0 %v1985_v24  ;;  %v2040_v9 = vld [vmem:[#allocation2 + $0x1c0] sm:$0xff]  ;;  %v83_v12 = vpack.c.bf16 %v73_v7, %v73_v7  ;;  %v2051_v21 = vld [vmem:[%s2396_s4 + $0x18] sm:$0xff]  ;;  %v2050_v23 = vld [vmem:[%s2396_s4 + $0x10] sm:$0xff] }
  0x26   :  { %622 = vmatpush.bf16.msra.mxu1 %v1993_v25  ;;  %v2052_v19 = vld [vmem:[%s2396_s4 + $0x20] sm:$0xff]  ;;  %v2063_v34 = vld [vmem:[%s2398_s6 + $0x38] sm:$0xff]  ;;  %v2061_v37 = vld [vmem:[%s2398_s6 + $0x28] sm:$0xff] }
  0x27   :  { %635 = vmatpush.bf16.msra.mxu2 %v2001_v26  ;;  %v1964_v7 = vld [vmem:[#allocation4 + $0x1e8] sm:$0xf0]  ;;  %v1922_v8 = vld [vmem:[#allocation4 + $0x180] sm:$0xf]  ;;  %v2112_v11 = vld [vmem:[#allocation4 + $0x184] sm:$0xf] }
  0x28   :  { %648 = vmatpush.bf16.msra.mxu3 %v2009_v27  ;;  %v2116_v10 = vld [vmem:[#allocation4 + $0x19c] sm:$0xf0] }
  0x29   :  { %610 = vmatpush.bf16.msra.mxu0 %v1984_v28  ;;  %v2049_v28 = vld [vmem:[%s2396_s4 + $0x8] sm:$0xff] }
  0x2a   :  { %623 = vmatpush.bf16.msra.mxu1 %v1992_v29  ;;  %v2134_v29 = vld [vmem:[%s2395_s3] ss:$0 sm:$0xff] }
  0x2b   :  { %636 = vmatpush.bf16.msra.mxu2 %v2000_v30  ;;  %v2048_v30 = vld [vmem:[%s2396_s4] sm:$0xff] }
  0x2c   :  { %649 = vmatpush.bf16.msra.mxu3 %v2008_v31  ;;  %611 = vmatmul.bf16.vlgmr.msra.gmra.mxu0 %v79_v41 }
  0x2d   :  { %655 = vmatpush.bf16.msrb.mxu0 %v2023_v32  ;;  %624 = vmatmul.bf16.vlgmr.msra.gmra.mxu1 %v80_v43 }
  0x2e   :  { %668 = vmatpush.bf16.msrb.mxu1 %v2031_v35  ;;  %637 = vmatmul.bf16.vlgmr.msra.gmra.mxu2 %v81_v40  ;;  %v2062_v35 = vld [vmem:[%s2398_s6 + $0x30] sm:$0xff] }
  0x2f   :  { %681 = vmatpush.bf16.msrb.mxu2 %v2039_v38  ;;  %650 = vmatmul.bf16.vlgmr.msra.gmra.mxu3 %v82_v42 }
  0x30   :  { %694 = vmatpush.bf16.msrb.mxu3 %v2047_v39 }
  0x31   :  { %656 = vmatpush.bf16.msrb.mxu0 %v2022_v44 }
  0x32   :  { %669 = vmatpush.bf16.msrb.mxu1 %v2030_v45 }
  0x33   :  { %682 = vmatpush.bf16.msrb.mxu2 %v2038_v46 }
  0x34   :  { %695 = vmatpush.bf16.msrb.mxu3 %v2046_v47 }
  0x35   :  { %657 = vmatpush.bf16.msrb.mxu0 %v2021_v48 }
  0x36   :  { %670 = vmatpush.bf16.msrb.mxu1 %v2029_v49 }
  0x37   :  { %683 = vmatpush.bf16.msrb.mxu2 %v2037_v50 }
  0x38   :  { %696 = vmatpush.bf16.msrb.mxu3 %v2045_v51 }
  0x39   :  { %658 = vmatpush.bf16.msrb.mxu0 %v2020_v52 }
  0x3a   :  { %671 = vmatpush.bf16.msrb.mxu1 %v2028_v53 }
  0x3b   :  { %684 = vmatpush.bf16.msrb.mxu2 %v2036_v54  ;;  %v2060_v54 = vld [vmem:[%s2398_s6 + $0x20] sm:$0xff] }
  0x3c   :  { %697 = vmatpush.bf16.msrb.mxu3 %v2044_v55  ;;  %v2059_v55 = vld [vmem:[%s2398_s6 + $0x18] sm:$0xff] }
  0x3d   :  { %659 = vmatpush.bf16.msrb.mxu0 %v2019_v56  ;;  %v2058_v56 = vld [vmem:[%s2398_s6 + $0x10] sm:$0xff] }
  0x3e   :  { %672 = vmatpush.bf16.msrb.mxu1 %v2027_v57  ;;  %v2057_v57 = vld [vmem:[%s2398_s6 + $0x8] sm:$0xff] }
  0x3f   :  { %685 = vmatpush.bf16.msrb.mxu2 %v2035_v58  ;;  %v790_v58 = vlaneseq }
  0x40   :  { %698 = vmatpush.bf16.msrb.mxu3 %v2043_v59  ;;  %v2056_v59 = vld [vmem:[%s2398_s6] sm:$0xff] }
  0x41   :  { %660 = vmatpush.bf16.msrb.mxu0 %v2018_v60  ;;  %v2342_v60 = vand.u32 127, %v790_v58  ;;  %v1794_v58 = vld [vmem:[#allocation4 + $0x80] sm:$0xf] }
  0x42   :  { %673 = vmatpush.bf16.msrb.mxu1 %v2026_v61  ;;  %v1954_v61 = vld [vmem:[#allocation4 + $0x1c0] sm:$0xf] }
  0x43   :  { %686 = vmatpush.bf16.msrb.mxu2 %v2034_v62  ;;  %v2124_v62 = vld [vmem:[#allocation4 + $0x1dc] sm:$0xf0]  ;;  %vm792_vm0 = vcmp.lt.s32.totalorder %v2342_v60, 64 }
  0x44   :  { %699 = vmatpush.bf16.msrb.mxu3 %v2042_v63  ;;  %v2120_v63 = vld [vmem:[#allocation4 + $0x1c4] sm:$0xf] }
  0x45   :  { %661 = vmatpush.bf16.msrb.mxu0 %v2017_v0  ;;  %v1955_v0 = vor.u32 %v2124_v62, %v1954_v61 }
  0x46   :  { %674 = vmatpush.bf16.msrb.mxu1 %v2025_v1  ;;  %v1956_v1 = vld [vmem:[#allocation4 + $0x1e0] sm:$0xf0] }
  0x47   :  { %687 = vmatpush.bf16.msrb.mxu2 %v2033_v2  ;;  %v1962_v2 = vld [vmem:[#allocation4 + $0x1c8] sm:$0xf] }
  0x48   :  { %700 = vmatpush.bf16.msrb.mxu3 %v2041_v3  ;;  %v2125_v3 = vld [vmem:[#allocation4 + $0x1e4] sm:$0xf0] }
  0x49   :  { %662 = vmatpush.bf16.msrb.mxu0 %v2016_v4  ;;  %v1959_v4 = vor.u32 %v2120_v63, %v1956_v1  ;;  %v2084_v63 = vld [vmem:[#allocation4 + $0x9c] sm:$0xf0] }
  0x4a   :  { %675 = vmatpush.bf16.msrb.mxu1 %v2024_v5  ;;  %v1963_v5 = vor.u32 %v2125_v3, %v1962_v2  ;;  %v1796_v2 = vld [vmem:[#allocation4 + $0xa0] sm:$0xf0]  ;;  %v1802_v3 = vld [vmem:[#allocation4 + $0x88] sm:$0xf] }
  0x4b   :  { %688 = vmatpush.bf16.msrb.mxu2 %v2032_v6  ;;  %v2121_v6 = vld [vmem:[#allocation4 + $0x1cc] sm:$0xf] }
  0x4c   :  { %701 = vmatpush.bf16.msrb.mxu3 %v2040_v9  ;;  %663 = vmatmul.bf16.vlgmr.msrb.gmra.mxu0 %v83_v12  ;;  %v1967_v9 = vor.u32 %v2121_v6, %v1964_v7  ;;  %v1924_v12 = vld [vmem:[#allocation4 + $0x1a0] sm:$0xf0]  ;;  %v2081_v6 = vld [vmem:[#allocation4 + $0x8c] sm:$0xf] }
  0x4d   :  { %676 = vmatmul.bf16.vlgmr.msrb.gmra.mxu1 %v84_v13  ;;  %777 = vmatpush.bf16.msra.mxu0 %v2055_v16  ;;  %v1923_v13 = vor.u32 %v2116_v10, %v1922_v8  ;;  %v2117_v16 = vld [vmem:[#allocation4 + $0x1a4] sm:$0xf0]  ;;  %v1804_v7 = vld [vmem:[#allocation4 + $0xa8] sm:$0xf0]  ;;  %v77_v8 = vld [vmem:[%s2393_s1] sm:$0xf] }
  0x4e   :  { %689 = vmatmul.bf16.vlgmr.msrb.gmra.mxu2 %v85_v14  ;;  %869 = vmatpush.bf16.msra.mxu1 %v2063_v34  ;;  %v1927_v14 = vor.u32 %v2112_v11, %v1924_v12  ;;  %v2100_v34 = vld [vmem:[#allocation4 + $0x11c] sm:$0xf0] }
  0x4f   :  { %702 = vmatmul.bf16.vlgmr.msrb.gmra.mxu3 %v86_v15  ;;  %1286 = vmatpush.bf16.msra.mxu2 %v1955_v0  ;;  %v1930_v15 = vld [vmem:[#allocation4 + $0x188] sm:$0xf]  ;;  %v2080_v0 = vld [vmem:[#allocation4 + $0x84] sm:$0xf] }
  0x50   :  { %1299 = vmatpush.bf16.msra.mxu3 %v1959_v4  ;;  %v2085_v4 = vld [vmem:[#allocation4 + $0xa4] sm:$0xf0]  ;;  %v1799_v11 = vor.u32 %v2080_v0, %v1796_v2  ;;  %v2115_v0 = vld [vmem:[#allocation4 + $0x19c] sm:$0xf] }
  0x51   :  { %778 = vmatpush.bf16.msra.mxu0 %v2054_v17  ;;  %v2113_v17 = vld [vmem:[#allocation4 + $0x18c] sm:$0xf]  ;;  %v1803_v12 = vor.u32 %v2085_v4, %v1802_v3  ;;  %v1906_v3 = vld [vmem:[#allocation4 + $0x150] sm:$0xf] }
  0x52   :  { %870 = vmatpush.bf16.msra.mxu1 %v2062_v35  ;;  %v2096_v35 = vld [vmem:[#allocation4 + $0x104] sm:$0xf]  ;;  %v2110_v4 = vld [vmem:[#allocation4 + $0x16c] sm:$0xf0] }
  0x53   :  { %1287 = vmatpush.bf16.msra.mxu2 %v1923_v13  ;;  %v1762_v13 = vld [vmem:[#allocation4 + $0x40] sm:$0xf] }
  0x54   :  { %1300 = vmatpush.bf16.msra.mxu3 %v1927_v14  ;;  %v2076_v14 = vld [vmem:[#allocation4 + $0x5c] sm:$0xf0] }
  0x55   :  { %779 = vmatpush.bf16.msra.mxu0 %v2053_v18  ;;  %v1931_v18 = vor.u32 %v2117_v16, %v1930_v15  ;;  %v2072_v15 = vld [vmem:[#allocation4 + $0x44] sm:$0xf]  ;;  %v1807_v16 = vor.u32 %v2081_v6, %v1804_v7  ;;  %v1907_v6 = vor.u32 %v2110_v4, %v1906_v3  ;;  %v1908_v7 = vld [vmem:[#allocation4 + $0x170] sm:$0xf0]  ;;  %v1754_v3 = vld [vmem:[#allocation4 + $0x18] sm:$0xf] }
  0x56   :  { %871 = vmatpush.bf16.msra.mxu1 %v2061_v37  ;;  %v1860_v37 = vld [vmem:[#allocation4 + $0x120] sm:$0xf0]  ;;  %v2071_v4 = vld [vmem:[#allocation4 + $0x34] sm:$0xf0] }
  0x59   :  { %780 = vmatpush.bf16.msra.mxu0 %v2052_v19  ;;  %v1932_v19 = vld [vmem:[#allocation4 + $0x1a8] sm:$0xf0] }
  0x5a   :  { %872 = vmatpush.bf16.msra.mxu1 %v2060_v54  ;;  %v2089_v54 = vld [vmem:[#allocation4 + $0xcc] sm:$0xf] }
  0x5d   :  { %781 = vmatpush.bf16.msra.mxu0 %v2051_v21  ;;  %v2108_v21 = vld [vmem:[#allocation4 + $0x15c] sm:$0xf0] }
  0x5e   :  { %873 = vmatpush.bf16.msra.mxu1 %v2059_v55  ;;  %v1836_v55 = vld [vmem:[#allocation4 + $0xe8] sm:$0xf0] }
  0x5f   :  { %v1839_v1 = vor.u32 %v2089_v54, %v1836_v55  ;;  %v1938_v54 = vld [vmem:[#allocation4 + $0x190] sm:$0xf] }
  0x60   :  { %v2118_v55 = vld [vmem:[#allocation4 + $0x1ac] sm:$0xf0] }
  0x61   :  { %782 = vmatpush.bf16.msra.mxu0 %v2050_v23  ;;  %v2104_v23 = vld [vmem:[#allocation4 + $0x144] sm:$0xf] }
  0x62   :  { %874 = vmatpush.bf16.msra.mxu1 %v2058_v56 }
  0x65   :  { %783 = vmatpush.bf16.msra.mxu0 %v2049_v28  ;;  %v2109_v28 = vld [vmem:[#allocation4 + $0x164] sm:$0xf0] }
  0x66   :  { %875 = vmatpush.bf16.msra.mxu1 %v2057_v57 }
  0x69   :  { %784 = vmatpush.bf16.msra.mxu0 %v2048_v30  ;;  %v1900_v30 = vld [vmem:[#allocation4 + $0x168] sm:$0xf0] }
  0x6a   :  { %876 = vmatpush.bf16.msra.mxu1 %v2056_v59 }
  0x6d   :  { %1312 = vmatpush.bf16.msrb.mxu0 %v1963_v5 }
  0x6e   :  { %1325 = vmatpush.bf16.msrb.mxu1 %v1967_v9  ;;  %v1795_v9 = vor.u32 %v2084_v63, %v1794_v58  ;;  %v1940_v58 = vld [vmem:[#allocation4 + $0x1b0] sm:$0xf0] }
  0x71   :  { %1313 = vmatpush.bf16.msrb.mxu0 %v1931_v18  ;;  %v1770_v18 = vld [vmem:[#allocation4 + $0x48] sm:$0xf] }
  0xa9   :  { %v612_v20 = vpop.f32.mrf.mxu0 }
  0xaa   :  { %v625_v22 = vpop.f32.mrf.mxu1  ;;  %v613_v33 = vadd.f32 %v2134_v29, %v612_v20  ;;  %v1890_v20 = vld [vmem:[#allocation4 + $0x140] sm:$0xf]  ;;  %v2105_v29 = vld [vmem:[#allocation4 + $0x14c] sm:$0xf] }
  0xac   :  { %v626_v36 = vadd.f32 %v625_v22, %v613_v33  ;;  %v1935_v22 = vor.u32 %v2113_v17, %v1932_v19  ;;  %v1858_v33 = vld [vmem:[#allocation4 + $0x100] sm:$0xf]  ;;  %v1764_v17 = vld [vmem:[#allocation4 + $0x60] sm:$0xf0]  ;;  %v2077_v19 = vld [vmem:[#allocation4 + $0x64] sm:$0xf0] }
  0xae   :  { %1326 = vmatpush.bf16.msrb.mxu1 %v1935_v22  ;;  %v1763_v22 = vor.u32 %v2076_v14, %v1762_v13  ;;  %v1916_v13 = vld [vmem:[#allocation4 + $0x178] sm:$0xf0] }
  0xb1   :  { %v638_v24 = vpop.f32.mrf.mxu2  ;;  %v614_v26 = vpop.f32.mrf.mxu0 }
  0xb2   :  { %v651_v25 = vpop.f32.mrf.mxu3  ;;  %v627_v27 = vpop.f32.mrf.mxu1  ;;  %v639_v38 = vadd.f32 %v638_v24, %v626_v36  ;;  %v1892_v24 = vld [vmem:[#allocation4 + $0x160] sm:$0xf0]  ;;  %v2135_v26 = vld [vmem:[%s2397_s5] ss:$0 sm:$0xff]  ;;  %v1903_v36 = vor.u32 %v2105_v29, %v1900_v30 }
  0xb3   :  { %v1891_v27 = vor.u32 %v2108_v21, %v1890_v20  ;;  %v2073_v20 = vld [vmem:[#allocation4 + $0x4c] sm:$0xf]  ;;  %v1732_v29 = vld [vmem:[#allocation4 + $0x20] sm:$0xf0] }
  0xb4   :  { %v652_v39 = vadd.f32 %v651_v25, %v639_v38  ;;  %v1898_v25 = vld [vmem:[#allocation4 + $0x148] sm:$0xf]  ;;  %1327 = vmatpush.bf16.msrb.mxu1 %v1903_v36  ;;  %v1772_v21 = vld [vmem:[#allocation4 + $0x68] sm:$0xf0]  ;;  %v1970_v36 = vld [vmem:[#allocation4 + $0x1d0] sm:$0xf] }
  0xb5   :  { %v1866_v38 = vld [vmem:[#allocation4 + $0x108] sm:$0xf]  ;;  %1288 = vmatpush.bf16.msra.mxu2 %v1891_v27  ;;  %v2068_v27 = vld [vmem:[#allocation4 + $0x1c] sm:$0xf0]  ;;  %v1775_v30 = vor.u32 %v2073_v20, %v1772_v21  ;;  %v1882_v20 = vld [vmem:[#allocation4 + $0x118] sm:$0xf] }
  0xb6   :  { %v2103_v21 = vld [vmem:[#allocation4 + $0x134] sm:$0xf0] }
  0xb9   :  { %v640_v31 = vpop.f32.mrf.mxu2 }
  0xba   :  { %v653_v32 = vpop.f32.mrf.mxu3  ;;  %v1895_v31 = vor.u32 %v2104_v23, %v1892_v24  ;;  %v1730_v23 = vld [vmem:[#allocation4] sm:$0xf]  ;;  %v78_v24 = vunpack.c.l.bf16 %v77_v8  ;;  %v1914_v8 = vld [vmem:[#allocation4 + $0x158] sm:$0xf] }
  0xbb   :  { %v1899_v32 = vor.u32 %v2109_v28, %v1898_v25  ;;  %v1767_v25 = vor.u32 %v2072_v15, %v1764_v17  ;;  %v2064_v28 = vld [vmem:[#allocation4 + $0x4] sm:$0xf]  ;;  %v1874_v15 = vld [vmem:[#allocation4 + $0x110] sm:$0xf]  ;;  %v2098_v17 = vld [vmem:[#allocation4 + $0x114] sm:$0xf] }
  0xbc   :  { %1301 = vmatpush.bf16.msra.mxu3 %v1895_v31  ;;  %v1738_v31 = vld [vmem:[#allocation4 + $0x8] sm:$0xf] }
  0xbd   :  { %1314 = vmatpush.bf16.msrb.mxu0 %v1899_v32  ;;  %v2069_v32 = vld [vmem:[#allocation4 + $0x24] sm:$0xf0] }
  0xc9   :  { %v664_v40 = vpop.f32.mrf.mxu0 }
  0xca   :  { %v677_v41 = vpop.f32.mrf.mxu1  ;;  %v665_v42 = vadd.f32 %v664_v40, %v652_v39  ;;  %v2101_v39 = vld [vmem:[#allocation4 + $0x124] sm:$0xf0]  ;;  %v2097_v40 = vld [vmem:[#allocation4 + $0x10c] sm:$0xf] }
  0xcc   :  { %v678_v43 = vadd.f32 %v677_v41, %v665_v42  ;;  %v1868_v41 = vld [vmem:[#allocation4 + $0x128] sm:$0xf0]  ;;  %v1859_v42 = vor.u32 %v2100_v34, %v1858_v33 }
  0xcd   :  { %v2065_v33 = vld [vmem:[#allocation4 + $0xc] sm:$0xf] }
  0xce   :  { %1289 = vmatpush.bf16.msra.mxu2 %v1859_v42  ;;  %v1978_v42 = vld [vmem:[#allocation4 + $0x1d8] sm:$0xf] }
  0xd1   :  { %v690_v44 = vpop.f32.mrf.mxu2  ;;  %v666_v47 = vpop.f32.mrf.mxu0 }
  0xd2   :  { %v703_v45 = vpop.f32.mrf.mxu3  ;;  %v691_v46 = vadd.f32 %v690_v44, %v678_v43  ;;  %v679_v48 = vpop.f32.mrf.mxu1  ;;  %v1863_v44 = vor.u32 %v2096_v35, %v1860_v37  ;;  %v2092_v47 = vld [vmem:[#allocation4 + $0xdc] sm:$0xf0]  ;;  %v1740_v35 = vld [vmem:[#allocation4 + $0x28] sm:$0xf0]  ;;  %v2126_v37 = vld [vmem:[#allocation4 + $0x1ec] sm:$0xf0] }
  0xd3   :  { %v2088_v48 = vld [vmem:[#allocation4 + $0xc4] sm:$0xf]  ;;  %v1743_v60 = vor.u32 %v2065_v33, %v1740_v35  ;;  %v2095_v33 = vld [vmem:[#allocation4 + $0xf4] sm:$0xf0] }
  0xd4   :  { %v704_v49 = vadd.f32 %v703_v45, %v691_v46  ;;  %v1867_v45 = vor.u32 %v2101_v39, %v1866_v38  ;;  %v1826_v46 = vld [vmem:[#allocation4 + $0xc0] sm:$0xf]  ;;  %1302 = vmatpush.bf16.msra.mxu3 %v1863_v44  ;;  %v1731_v39 = vor.u32 %v2068_v27, %v1730_v23  ;;  %v1735_v44 = vor.u32 %v2064_v28, %v1732_v29  ;;  %v1842_v27 = vld [vmem:[#allocation4 + $0xd0] sm:$0xf]  ;;  %v2090_v29 = vld [vmem:[#allocation4 + $0xd4] sm:$0xf] }
  0xd5   :  { %v1827_v57 = vor.u32 %v2092_v47, %v1826_v46  ;;  %v2123_v46 = vld [vmem:[#allocation4 + $0x1dc] sm:$0xf]  ;;  %v1883_v23 = vor.u32 %v2103_v21, %v1882_v20  ;;  %v2094_v28 = vld [vmem:[#allocation4 + $0xec] sm:$0xf0] }
  0xd6   :  { %2137 = vtanh.f32 %v704_v49  ;;  %1315 = vmatpush.bf16.msrb.mxu0 %v1867_v45  ;;  %v2127_v45 = vld [vmem:[#allocation4 + $0x1f4] sm:$0xf0]  ;;  %v1980_v47 = vld [vmem:[#allocation4 + $0x1f8] sm:$0xf0] }
  0xd7   :  { %1290 = vmatpush.bf16.msra.mxu2 %v1827_v57  ;;  %v1939_v57 = vor.u32 %v2118_v55, %v1938_v54  ;;  %v1786_v54 = vld [vmem:[#allocation4 + $0x58] sm:$0xf] }
  0xd9   :  { %v692_v50 = vpop.f32.mrf.mxu2 }
  0xda   :  { %v705_v51 = vpop.f32.mrf.mxu3  ;;  %v1871_v50 = vor.u32 %v2097_v40, %v1868_v41  ;;  %v2122_v40 = vld [vmem:[#allocation4 + $0x1d4] sm:$0xf] }
  0xdb   :  { %v1828_v51 = vld [vmem:[#allocation4 + $0xe0] sm:$0xf0]  ;;  %1291 = vmatpush.bf16.msra.mxu2 %v1795_v9  ;;  %v1972_v41 = vld [vmem:[#allocation4 + $0x1f0] sm:$0xf0]  ;;  %v2111_v9 = vld [vmem:[#allocation4 + $0x174] sm:$0xf0] }
  0xdc   :  { %v2138_v52 = vpop.eup %2137  ;;  %v1831_v61 = vor.u32 %v2088_v48, %v1828_v51  ;;  %1328 = vmatpush.bf16.msrb.mxu1 %v1871_v50  ;;  %v1739_v48 = vor.u32 %v2069_v32, %v1738_v31  ;;  %v1971_v50 = vor.u32 %v2126_v37, %v1970_v36  ;;  %v1975_v51 = vor.u32 %v2122_v40, %v1972_v41  ;;  %v1844_v31 = vld [vmem:[#allocation4 + $0xf0] sm:$0xf0]  ;;  %v1850_v32 = vld [vmem:[#allocation4 + $0xd8] sm:$0xf]  ;;  %v2091_v36 = vld [vmem:[#allocation4 + $0xdc] sm:$0xf] }
  0xdd   :  { %v708_v53 = vpack.c.bf16 %v2138_v52, %v2138_v52  ;;  %v1834_v52 = vld [vmem:[#allocation4 + $0xc8] sm:$0xf]  ;;  %v1851_v35 = vor.u32 %v2095_v33, %v1850_v32  ;;  %v1852_v37 = vld [vmem:[#allocation4 + $0xf8] sm:$0xf0]  ;;  %v2086_v40 = vld [vmem:[#allocation4 + $0xac] sm:$0xf0] }
  0xde   :  { %1303 = vmatpush.bf16.msra.mxu3 %v1831_v61  ;;  %v2119_v61 = vld [vmem:[#allocation4 + $0x1b4] sm:$0xf0]  ;;  %v2082_v41 = vld [vmem:[#allocation4 + $0x94] sm:$0xf] }
  0xdf   :  { %785 = vmatmul.bf16.vlgmr.msra.gmra.mxu0 %v708_v53  ;;  %v2093_v53 = vld [vmem:[#allocation4 + $0xe4] sm:$0xf0]  ;;  %1292 = vmatpush.bf16.msra.mxu2 %v1763_v22 }
  0xe0   :  { %v1835_v62 = vor.u32 %v2093_v53, %v1834_v52  ;;  %1329 = vmatpush.bf16.msrb.mxu1 %v1839_v1  ;;  %v1979_v52 = vor.u32 %v2127_v45, %v1978_v42  ;;  %v1983_v53 = vor.u32 %v2123_v46, %v1980_v47  ;;  %v1948_v1 = vld [vmem:[#allocation4 + $0x1b8] sm:$0xf0]  ;;  %v1812_v42 = vld [vmem:[#allocation4 + $0xb0] sm:$0xf0]  ;;  %v1818_v45 = vld [vmem:[#allocation4 + $0x98] sm:$0xf] }
  0xe1   :  { %v1951_v2 = vor.u32 %v2115_v0, %v1948_v1  ;;  %v2087_v46 = vld [vmem:[#allocation4 + $0xb4] sm:$0xf0]  ;;  %v2083_v47 = vld [vmem:[#allocation4 + $0x9c] sm:$0xf]  ;;  %v2066_v0 = vld [vmem:[#allocation4 + $0x14] sm:$0xf] }
  0xe2   :  { %1316 = vmatpush.bf16.msrb.mxu0 %v1835_v62  ;;  %1304 = vmatpush.bf16.msra.mxu3 %v1799_v11  ;;  %v1915_v11 = vor.u32 %v2111_v9, %v1914_v8  ;;  %v1755_v9 = vor.u32 %v2071_v4, %v1754_v3 }
  0xe3   :  { %1293 = vmatpush.bf16.msra.mxu2 %v1731_v39  ;;  %v1855_v39 = vor.u32 %v2091_v36, %v1852_v37 }
  0xe4   :  { %1330 = vmatpush.bf16.msrb.mxu1 %v1807_v16  ;;  %v2102_v16 = vld [vmem:[#allocation4 + $0x12c] sm:$0xf0] }
  0xe6   :  { %1317 = vmatpush.bf16.msrb.mxu0 %v1803_v12  ;;  %1305 = vmatpush.bf16.msra.mxu3 %v1767_v25  ;;  %v2107_v12 = vld [vmem:[#allocation4 + $0x15c] sm:$0xf] }
  0xe7   :  { %1338 = vmatpush.bf16.msrb.mxu2 %v1971_v50  ;;  %v1919_v14 = vor.u32 %v2107_v12, %v1916_v13  ;;  %v1884_v25 = vld [vmem:[#allocation4 + $0x138] sm:$0xf0]  ;;  %v2078_v50 = vld [vmem:[#allocation4 + $0x6c] sm:$0xf0] }
  0xe8   :  { %1331 = vmatpush.bf16.msrb.mxu1 %v1775_v30  ;;  %v1843_v30 = vor.u32 %v2094_v28, %v1842_v27 }
  0xea   :  { %1306 = vmatpush.bf16.msra.mxu3 %v1735_v44  ;;  %v1815_v44 = vor.u32 %v2082_v41, %v1812_v42 }
  0xeb   :  { %1339 = vmatpush.bf16.msrb.mxu2 %v1939_v57  ;;  %v2075_v57 = vld [vmem:[#allocation4 + $0x5c] sm:$0xf] }
  0xec   :  { %1332 = vmatpush.bf16.msrb.mxu1 %v1743_v60  ;;  %v1820_v60 = vld [vmem:[#allocation4 + $0xb8] sm:$0xf0] }
  0xee   :  { %1351 = vmatpush.bf16.msrb.mxu3 %v1975_v51  ;;  %v1823_v51 = vor.u32 %v2083_v47, %v1820_v60 }
  0xef   :  { %1340 = vmatpush.bf16.msrb.mxu2 %v1907_v6  ;;  %v1756_v6 = vld [vmem:[#allocation4 + $0x38] sm:$0xf0] }
 0x15c   :  { %v786_v43 = vpop.f32.mrf.mxu0 }
 0x15d   :  { %v2348_v49 = vadd.f32 %v2135_v26, %v786_v43  ;;  %v1771_v26 = vor.u32 %v2077_v19, %v1770_v18  ;;  %v1875_v18 = vor.u32 %v2102_v16, %v1874_v15  ;;  %v1876_v19 = vld [vmem:[#allocation4 + $0x130] sm:$0xf0] }
 0x15e   :  { %v1879_v22 = vor.u32 %v2098_v17, %v1876_v19  ;;  %v948_v17 = vld [vmem:[%s2401_s9] sm:$0xff] }
 0x15f   :  { %v793_v56 = vsel %vm792_vm0, 0.0, %v2348_v49  ;;  %1318 = vmatpush.bf16.msrb.mxu0 %v1771_v26  ;;  %1341 = vmatpush.bf16.msrb.mxu2 %v1875_v18  ;;  %v952_v18 = vperm.slane %v948_v17, 2  ;;  %v953_v19 = vperm.slane %v948_v17, 3  ;;  %v955_v41 = vperm.slane %v948_v17, 5 }
 0x160   :  { %v794_v59 = vmul.f32 0.5, %v793_v56  ;;  %v2114_v56 = vld [vmem:[#allocation4 + $0x194] sm:$0xf] }
 0x161   :  { %v1943_v62 = vor.u32 %v2114_v56, %v1940_v58  ;;  %v2079_v56 = vld [vmem:[#allocation4 + $0x74] sm:$0xf0]  ;;  %v1788_v58 = vld [vmem:[#allocation4 + $0x78] sm:$0xf0] }
 0x162   :  { %v795_v5 = vmul.f32 1.442695, %v794_v59  ;;  %v1946_v59 = vld [vmem:[#allocation4 + $0x198] sm:$0xf]  ;;  %v1791_v1 = vor.u32 %v2075_v57, %v1788_v58 }
 0x163   :  { %1319 = vmatpush.bf16.msrb.mxu0 %v1739_v48  ;;  %v1947_v63 = vor.u32 %v2119_v61, %v1946_v59  ;;  %1352 = vmatpush.bf16.msrb.mxu3 %v1943_v62  ;;  %v1819_v48 = vor.u32 %v2087_v46, %v1818_v45  ;;  %v1787_v61 = vor.u32 %v2079_v56, %v1786_v54  ;;  %v1746_v62 = vld [vmem:[#allocation4 + $0x10] sm:$0xf] }
 0x164   :  { %2139 = vpow2.f32 %v795_v5  ;;  %v788_v10 = vpop.f32.mrf.mxu0  ;;  %v2106_v5 = vld [vmem:[#allocation4 + $0x154] sm:$0xf]  ;;  %1342 = vmatpush.bf16.msrb.mxu2 %v1843_v30 }
 0x165   :  { %v1911_v10 = vor.u32 %v2106_v5, %v1908_v7  ;;  %v2067_v5 = vld [vmem:[#allocation4 + $0x1c] sm:$0xf] }
 0x167   :  { %1364 = vmatpush.bf16.msra.mxu0 %v1979_v52  ;;  %1353 = vmatpush.bf16.msrb.mxu3 %v1911_v10  ;;  %v2074_v52 = vld [vmem:[#allocation4 + $0x54] sm:$0xf]  ;;  %v1759_v10 = vor.u32 %v2067_v5, %v1756_v6 }
 0x16a   :  { %v2140_v34 = vpop.eup %2139 }
 0x16b   :  { %v797_v38 = vsel %vm792_vm0, %v2348_v49, %v2140_v34  ;;  %1365 = vmatpush.bf16.msra.mxu0 %v1947_v63  ;;  %1354 = vmatpush.bf16.msrb.mxu3 %v1879_v22  ;;  %v1847_v34 = vor.u32 %v2090_v29, %v1844_v31  ;;  %v2070_v63 = vld [vmem:[#allocation4 + $0x2c] sm:$0xf0] }
 0x16c   :  { %798 = vst [vmem:[%s2402_s10] sm:$0xff] %v797_v38  ;;  %v799_v43 = vmul.f32 %v797_v38, %v78_v24  ;;  %v2099_v24 = vld [vmem:[#allocation4 + $0x11c] sm:$0xf]  ;;  %v1810_v38 = vld [vmem:[#allocation4 + $0x90] sm:$0xf]  ;;  %v1747_v7 = vor.u32 %v2070_v63, %v1746_v62 }
 0x16d   :  { %v1887_v26 = vor.u32 %v2099_v24, %v1884_v25  ;;  %v950_v24 = vperm.slane %v948_v17, 0  ;;  %v951_v25 = vperm.slane %v948_v17, 1 }
 0x16e   :  { %v800_v49 = vpack.c.bf16 %v799_v43, %v799_v43  ;;  %v1811_v43 = vor.u32 %v2086_v40, %v1810_v38  ;;  %v954_v40 = vperm.slane %v948_v17, 4 }
 0x16f   :  { %1366 = vmatpush.bf16.msra.mxu0 %v1915_v11  ;;  %1355 = vmatpush.bf16.msrb.mxu3 %v1847_v34  ;;  %v2136_v11 = vld [vmem:[%s2399_s7] ss:$0 sm:$0xff]  ;;  %v956_v34 = vperm.slane %v948_v17, 6 }
 0x170   :  { %877 = vmatmul.bf16.vlgmr.msra.gmra.mxu1 %v800_v49  ;;  %v1778_v49 = vld [vmem:[#allocation4 + $0x50] sm:$0xf]  ;;  %1343 = vmatpush.bf16.msrb.mxu2 %v1811_v43 }
 0x171   :  { %1377 = vmatpush.bf16.msra.mxu1 %v1983_v53  ;;  %v1780_v53 = vld [vmem:[#allocation4 + $0x70] sm:$0xf0]  ;;  %v1779_v55 = vor.u32 %v2078_v50, %v1778_v49 }
 0x172   :  { %v1783_v59 = vor.u32 %v2074_v52, %v1780_v53 }
 0x173   :  { %1367 = vmatpush.bf16.msra.mxu0 %v1883_v23  ;;  %1356 = vmatpush.bf16.msrb.mxu3 %v1815_v44 }
 0x174   :  { %1344 = vmatpush.bf16.msrb.mxu2 %v1779_v55 }
 0x175   :  { %1378 = vmatpush.bf16.msra.mxu1 %v1951_v2  ;;  %v1748_v2 = vld [vmem:[#allocation4 + $0x30] sm:$0xf0] }
 0x176   :  { %v1751_v8 = vor.u32 %v2066_v0, %v1748_v2 }
 0x177   :  { %1368 = vmatpush.bf16.msra.mxu0 %v1851_v35  ;;  %1357 = vmatpush.bf16.msrb.mxu3 %v1783_v59  ;;  %v957_v35 = vperm.slane %v948_v17, 7 }
 0x178   :  { %1345 = vmatpush.bf16.msrb.mxu2 %v1747_v7 }
 0x179   :  { %1379 = vmatpush.bf16.msra.mxu1 %v1919_v14 }
 0x17b   :  { %1369 = vmatpush.bf16.msra.mxu0 %v1819_v48  ;;  %1358 = vmatpush.bf16.msrb.mxu3 %v1751_v8 }
 0x17d   :  { %1380 = vmatpush.bf16.msra.mxu1 %v1887_v26 }
 0x17f   :  { %1370 = vmatpush.bf16.msra.mxu0 %v1787_v61 }
 0x181   :  { %1381 = vmatpush.bf16.msra.mxu1 %v1855_v39 }
 0x183   :  { %1371 = vmatpush.bf16.msra.mxu0 %v1755_v9 }
 0x185   :  { %1382 = vmatpush.bf16.msra.mxu1 %v1823_v51 }
 0x189   :  { %1383 = vmatpush.bf16.msra.mxu1 %v1791_v1 }
 0x18d   :  { %1384 = vmatpush.bf16.msra.mxu1 %v1759_v10 }
 0x1ed   :  { %v878_v12 = vpop.f32.mrf.mxu1 }
 0x1ee   :  { %v879_v13 = vadd.f32 %v2136_v11, %v878_v12 }
 0x1f0   :  { %2141 = vtanh.f32 %v879_v13 }
 0x1f5   :  { %v880_v14 = vpop.f32.mrf.mxu1 }
 0x1f6   :  { %v2142_v15 = vpop.eup %2141 }
 0x1f7   :  { %v883_v16 = vpack.c.bf16 %v2142_v15, %v2142_v15 }
 0x1f9   :  { %1294 = vmatmul.bf16.vlgmr.msra.gmra.mxu2 %v883_v16  ;;  %1307 = vmatmul.bf16.vlgmr.msra.gmra.mxu3 %v883_v16 }
 0x1fa   :  { %1320 = vmatmul.bf16.vlgmr.msrb.gmra.mxu0 %v883_v16  ;;  %1333 = vmatmul.bf16.vlgmr.msrb.gmra.mxu1 %v883_v16 }
 0x209   :  { %1346 = vmatmul.bf16.vlgmr.msrb.gmra.mxu2 %v883_v16  ;;  %1359 = vmatmul.bf16.vlgmr.msrb.gmra.mxu3 %v883_v16 }
 0x20a   :  { %1372 = vmatmul.bf16.vlgmr.msra.gmra.mxu0 %v883_v16  ;;  %1385 = vmatmul.bf16.vlgmr.msra.gmra.mxu1 %v883_v16 }
 0x277   :  { %v1321_v20 = vpop.f32.mrf.mxu0  ;;  %v1334_v21 = vpop.f32.mrf.mxu1 }
 0x278   :  { %v1322_v22 = vadd.f32 %v1321_v20, %v952_v18  ;;  %v1335_v23 = vadd.f32 %v1334_v21, %v953_v19 }
 0x27a   :  { %1392 = vst [vmem:[%s2403_s11 + $0x10] sm:$0xff] %v1322_v22 }
 0x27b   :  { %1393 = vst [vmem:[%s2403_s11 + $0x18] sm:$0xff] %v1335_v23 }
 0x27c   :  { %v1295_v26 = vpop.f32.mrf.mxu2  ;;  %v1308_v27 = vpop.f32.mrf.mxu3 }
 0x27d   :  { %v1296_v28 = vadd.f32 %v1295_v26, %v950_v24  ;;  %v1309_v29 = vadd.f32 %v1308_v27, %v951_v25 }
 0x27f   :  { %1390 = vst [vmem:[%s2403_s11] sm:$0xff] %v1296_v28  ;;  %v1323_v30 = vpop.f32.mrf.mxu0  ;;  %v1336_v31 = vpop.f32.mrf.mxu1 }
 0x280   :  { %1391 = vst [vmem:[%s2403_s11 + $0x8] sm:$0xff] %v1309_v29 }
 0x284   :  { %v1297_v32 = vpop.f32.mrf.mxu2  ;;  %v1310_v33 = vpop.f32.mrf.mxu3 }
 0x287   :  { %v1373_v36 = vpop.f32.mrf.mxu0  ;;  %v1386_v37 = vpop.f32.mrf.mxu1 }
 0x288   :  { %v1374_v38 = vadd.f32 %v1373_v36, %v956_v34  ;;  %v1387_v39 = vadd.f32 %v1386_v37, %v957_v35 }
 0x28a   :  { %1396 = vst [vmem:[%s2403_s11 + $0x30] sm:$0xff] %v1374_v38 }
 0x28b   :  { %1397 = vst [vmem:[%s2403_s11 + $0x38] sm:$0xff] %v1387_v39 }
 0x28c   :  { %v1347_v42 = vpop.f32.mrf.mxu2  ;;  %v1360_v43 = vpop.f32.mrf.mxu3 }
 0x28d   :  { %v1348_v44 = vadd.f32 %v1347_v42, %v954_v40  ;;  %v1361_v45 = vadd.f32 %v1360_v43, %v955_v41 }
 0x28f   :  { %1394 = vst [vmem:[%s2403_s11 + $0x20] sm:$0xff] %v1348_v44  ;;  %v1375_v46 = vpop.f32.mrf.mxu0  ;;  %v1388_v47 = vpop.f32.mrf.mxu1 }
 0x290   :  { %1395 = vst [vmem:[%s2403_s11 + $0x28] sm:$0xff] %v1361_v45 }
 0x294   :  { %v1349_v48 = vpop.f32.mrf.mxu2  ;;  %v1362_v60 = vpop.f32.mrf.mxu3 }
 0x295   :  { %1406 = vsyncpa [#allocation3], 1 }
 0x296   :  { %1407 = vsyncpa [#allocation5], 1 }

</bundles_post_ra>
